<compile_context>
chip_gen: v5e
topology: v5e:2x2
jax: 0.10.0
libtpu: 0.0.40
codegen_flags: <defaults>
</compile_context>

<pallas_src>
import jax
import jax.numpy as jnp
from jax.experimental import pallas as pl
from jax.experimental.pallas import tpu as pltpu


# -----------------------------------------------------------------------------
# Small helpers
# -----------------------------------------------------------------------------
def _round_up(x, m):
    return ((x + m - 1) // m) * m


def _cast(x, dtype):
    return x if x.dtype == dtype else x.astype(dtype)


def _pad2(x, rows, cols):
    pr, pc = rows - x.shape[0], cols - x.shape[1]
    if pr or pc:
        x = jnp.pad(x, ((0, pr), (0, pc)))
    return x


def _choose_tile(n128, max_tile):
    """Pick a stage-2 tile (multiple of 128) trading padding waste against the
    ~0.35us per-grid-step overhead (128 tiles ~29% of HBM roofline vs ~85% at 512)."""
    best_t, best_cost = 128, None
    for t in (1024, 512, 384, 256, 128):
        if t > max_tile:
            continue
        cost = _round_up(n128, t) * (1.0 + 64.0 / t)
        if best_cost is None or cost < best_cost:
            best_t, best_cost = t, cost
    return best_t


def _divisor_tile(n, max_tile=512):
    """Largest multiple of 128 that divides n (n is already a multiple of 128)."""
    t = min(max_tile, n)
    t -= t % 128
    while t > 128 and n % t:
        t -= 128
    return max(t, 128)


def _shrink(t):
    return max(128, (t // 2) // 128 * 128)


# -----------------------------------------------------------------------------
# Stage 1: support = features @ W    (rows parallel, K blocked, f32 accumulator)
# -----------------------------------------------------------------------------
def _support_kernel(feat_ref, w_ref, out_ref, acc_ref):
    kk = pl.program_id(1)

    @pl.when(kk == 0)
    def _():
        acc_ref[...] = jnp.zeros_like(acc_ref)

    acc_ref[...] += jnp.dot(feat_ref[...], w_ref[...],
                            preferred_element_type=jnp.float32)

    @pl.when(kk == pl.num_programs(1) - 1)
    def _():
        out_ref[...] = acc_ref[...].astype(out_ref.dtype)


# -----------------------------------------------------------------------------
# Stage 2: out = relu(adj @ support)
#   adj streamed in (tile_m, tile_k) blocks; support resident (sliced in-kernel)
#   or streamed in (tile_k, out_f) blocks; f32 VMEM accumulator.
# -----------------------------------------------------------------------------
def _make_aggregate_kernel(support_resident, tile_k):
    def kernel(adj_ref, sup_ref, out_ref, acc_ref):
        k = pl.program_id(1)

        @pl.when(k == 0)
        def _():
            acc_ref[...] = jnp.zeros_like(acc_ref)

        if support_resident:
            off = pl.multiple_of(k * tile_k, tile_k)
            sup = sup_ref[pl.ds(off, tile_k), :]
        else:
            sup = sup_ref[...]
        acc_ref[...] += jnp.dot(adj_ref[...], sup,
                                preferred_element_type=jnp.float32)

        @pl.when(k == pl.num_programs(1) - 1)
        def _():
            out_ref[...] = jnp.maximum(acc_ref[...], 0.0).astype(out_ref.dtype)

    return kernel


# -----------------------------------------------------------------------------
# Active path stage 1a: s = features @ w_sum   (mat-vec, f32 for accuracy)
# -----------------------------------------------------------------------------
def _matvec_kernel(feat_ref, wsum_ref, out_ref, acc_ref):
    kk = pl.program_id(1)

    @pl.when(kk == 0)
    def _():
        acc_ref[...] = jnp.zeros_like(acc_ref)

    prod = feat_ref[...].astype(jnp.float32) * wsum_ref[...]
    acc_ref[...] += jnp.sum(prod, axis=-1, keepdims=True)

    @pl.when(kk == pl.num_programs(1) - 1)
    def _():
        out_ref[...] = acc_ref[...].astype(out_ref.dtype)


# -----------------------------------------------------------------------------
# Active path stage 2a: out = relu(adj @ s)   — streams only adj; s VMEM-resident.
# -----------------------------------------------------------------------------
def _make_active_kernel(tile_k):
    def kernel(adj_ref, s_ref, out_ref, acc_ref):
        k = pl.program_id(1)

        @pl.when(k == 0)
        def _():
            acc_ref[...] = jnp.zeros_like(acc_ref)

        off = pl.multiple_of(k * tile_k, tile_k)
        s_blk = s_ref[:, pl.ds(off, tile_k)]                     # (1, tile_k) f32
        prod = adj_ref[...].astype(jnp.float32) * s_blk          # (tile_m, tile_k)
        acc_ref[...] += jnp.sum(prod, axis=-1, keepdims=True)    # (tile_m, 1)

        @pl.when(k == pl.num_programs(1) - 1)
        def _():
            out_ref[...] = jnp.maximum(acc_ref[...], 0.0).astype(out_ref.dtype)

    return kernel


# -----------------------------------------------------------------------------
# Wrapper
# -----------------------------------------------------------------------------
def gnn_layer_forward(
    features,
    adj,
    weight,
    active=False,
    *,
    compute_dtype=jnp.bfloat16,   # operand dtype (adj / features / W / support); f32 opt-in
    out_dtype=jnp.float32,
    vmem_limit_bytes=48 * 1024 * 1024,   # < v7x's 64 MiB physical VMEM
):
    """relu(adj @ (features @ weight)); relu(rowsum(...)) when active=True."""
    n, in_f = features.shape
    in_f2, out_f = weight.shape
    assert in_f == in_f2
    assert adj.shape == (n, n)

    adj_isz = jnp.dtype(compute_dtype).itemsize
    out_isz = jnp.dtype(out_dtype).itemsize
    n128 = _round_up(n, 128)
    in_f_pad = _round_up(in_f, 128)
    out_f_pad = _round_up(out_f, 128)

    # ---- stage-2 tile selection (adj is the streamed, HBM-bound operand) ---------
    tile_k = _choose_tile(n128, 1024 if adj_isz <= 2 else 512)
    tile_m = _choose_tile(n128, 512)
    # v7x: 2 TensorCores per chip — keep >= 2 blocks on the parallel row axis.
    if n128 > 128 and _round_up(n, tile_m) // tile_m < 2:
        tile_m = _shrink(tile_m)

    # ---- VMEM working-set fit (sized for v7x's 64 MiB physical) ------------------
    budget = min(int(0.8 * vmem_limit_bytes), 40 * 1024 * 1024)
    eff_out = out_f_pad if not active else 128
    support_resident = (not active) and (
        2 * _round_up(n, tile_k) * out_f_pad * adj_isz <= 16 * 1024 * 1024)

    def _est():
        sup_buf = (2 * _round_up(n, tile_k) * out_f_pad * adj_isz if support_resident
                   else 2 * tile_k * eff_out * adj_isz)
        return (2 * tile_m * tile_k * adj_isz + sup_buf
                + tile_m * eff_out * 4 + 2 * tile_m * eff_out * out_isz)

    while _est() > budget and tile_m > 256:
        tile_m = _shrink(tile_m)
    if _est() > budget and support_resident:
        support_resident = False
    while _est() > budget and tile_m > 128:
        tile_m = _shrink(tile_m)
    while _est() > budget and tile_k > 128:
        tile_k = _shrink(tile_k)

    n_rows_pad = _round_up(n, tile_m)     # adj rows / output rows
    n_cols_pad = _round_up(n, tile_k)     # adj cols / features & support rows

    # Pad/cast adj only when needed. (Multi-layer GNNs: pre-cast adj to compute_dtype
    # once in the caller and reuse it across layers to avoid repeated HBM copies.)
    adj_p = _pad2(_cast(adj, compute_dtype), n_rows_pad, n_cols_pad)

    cparams = pltpu.CompilerParams(
        dimension_semantics=("parallel", "arbitrary"),
        vmem_limit_bytes=vmem_limit_bytes,
    )
    grid2 = (n_rows_pad // tile_m, n_cols_pad // tile_k)

    if active:
        # rowsum(adj @ F @ W) == adj @ (F @ W.sum(axis=1))  (exact algebra).
        # Features / w_sum stay f32 — negligible traffic next to adj, better accuracy.
        w_sum_p = _pad2(jnp.sum(_cast(weight, jnp.float32), axis=1).reshape(1, in_f),
                        1, in_f_pad)
        feats_p = _pad2(_cast(features, jnp.float32), n_cols_pad, in_f_pad)

        tile_m1 = _divisor_tile(n_cols_pad, 512)
        tile_k1 = _divisor_tile(in_f_pad, 512)
        s = pl.pallas_call(
            _matvec_kernel,
            out_shape=jax.ShapeDtypeStruct((n_cols_pad, 1), jnp.float32),
            grid_spec=pltpu.PrefetchScalarGridSpec(
                num_scalar_prefetch=0,
                grid=(n_cols_pad // tile_m1, in_f_pad // tile_k1),
                in_specs=[
                    pl.BlockSpec((tile_m1, tile_k1), lambda i, kk: (i, kk)),
                    pl.BlockSpec((1, tile_k1), lambda i, kk: (0, kk)),
                ],
                out_specs=pl.BlockSpec((tile_m1, 1), lambda i, kk: (i, 0)),
                scratch_shapes=[pltpu.VMEM((tile_m1, 1), jnp.float32)],
            ),
            compiler_params=cparams,
        )(feats_p, w_sum_p)

        s_row = s.reshape(1, n_cols_pad)          # lane-dense resident stage-2 operand

        out = pl.pallas_call(
            _make_active_kernel(tile_k),
            out_shape=jax.ShapeDtypeStruct((n_rows_pad, 1), out_dtype),
            grid_spec=pltpu.PrefetchScalarGridSpec(
                num_scalar_prefetch=0,
                grid=grid2,
                in_specs=[
                    pl.BlockSpec((tile_m, tile_k), lambda i, k: (i, k)),   # adj stream
                    pl.BlockSpec((1, n_cols_pad), lambda i, k: (0, 0)),    # s resident
                ],
                out_specs=pl.BlockSpec((tile_m, 1), lambda i, k: (i, 0)),
                scratch_shapes=[pltpu.VMEM((tile_m, 1), jnp.float32)],
            ),
            compiler_params=cparams,
        )(adj_p, s_row)
        return out[:n, 0]

    # -------------------------- active == False ----------------------------------
    feats_p = _pad2(_cast(features, compute_dtype), n_cols_pad, in_f_pad)
    w_p = _pad2(_cast(weight, compute_dtype), in_f_pad, out_f_pad)

    tile_m1 = _divisor_tile(n_cols_pad, 512)
    tile_k1 = _divisor_tile(in_f_pad, 512)        # K-blocked: in_f-scalable on v7x
    support = pl.pallas_call(
        _support_kernel,
        out_shape=jax.ShapeDtypeStruct((n_cols_pad, out_f_pad), compute_dtype),
        grid_spec=pltpu.PrefetchScalarGridSpec(
            num_scalar_prefetch=0,
            grid=(n_cols_pad // tile_m1, in_f_pad // tile_k1),
            in_specs=[
                pl.BlockSpec((tile_m1, tile_k1), lambda i, kk: (i, kk)),
                pl.BlockSpec((tile_k1, out_f_pad), lambda i, kk: (kk, 0)),
            ],
            out_specs=pl.BlockSpec((tile_m1, out_f_pad), lambda i, kk: (i, 0)),
            scratch_shapes=[pltpu.VMEM((tile_m1, out_f_pad), jnp.float32)],
        ),
        compiler_params=cparams,
    )(feats_p, w_p)

    if support_resident:
        sup_spec = pl.BlockSpec((n_cols_pad, out_f_pad), lambda i, k: (0, 0))
    else:
        sup_spec = pl.BlockSpec((tile_k, out_f_pad), lambda i, k: (k, 0))

    out = pl.pallas_call(
        _make_aggregate_kernel(support_resident, tile_k),
        out_shape=jax.ShapeDtypeStruct((n_rows_pad, out_f_pad), out_dtype),
        grid_spec=pltpu.PrefetchScalarGridSpec(
            num_scalar_prefetch=0,
            grid=grid2,
            in_specs=[
                pl.BlockSpec((tile_m, tile_k), lambda i, k: (i, k)),       # adj stream
                sup_spec,
            ],
            out_specs=pl.BlockSpec((tile_m, out_f_pad), lambda i, k: (i, 0)),
            scratch_shapes=[pltpu.VMEM((tile_m, out_f_pad), jnp.float32)],
        ),
        compiler_params=cparams,
    )(adj_p, support)
    return out[:n, :out_f]


# -----------------------------------------------------------------------------
# Demo / self-test
# -----------------------------------------------------------------------------
if __name__ == "__main__":
    key = jax.random.PRNGKey(0)
    # Deliberately non-aligned small shapes; the wrapper pads to 128 multiples.
    N, IN_F, OUT_F = 300, 48, 80

    kf, ka, kw = jax.random.split(key, 3)
    features = jax.random.normal(kf, (N, IN_F), jnp.float32)

    # Synthetic dense row-normalized adjacency (torch.spmm on a dense adj).
    adj = (jax.random.uniform(ka, (N, N)) < 0.05).astype(jnp.float32)
    adj = adj + jnp.eye(N, dtype=jnp.float32)
    adj = adj / jnp.sum(adj, axis=1, keepdims=True)

    # xavier_uniform-style weight, as in GNNLayer.__init__.
    bound = (6.0 / (IN_F + OUT_F)) ** 0.5
    weight = jax.random.uniform(kw, (IN_F, OUT_F), jnp.float32, -bound, bound)

    # Gold reference at highest matmul precision (active=True attention => beta == 1).
    hp = jax.lax.Precision.HIGHEST
    z_ref = jnp.dot(adj, jnp.dot(features, weight, precision=hp), precision=hp)
    ref = jnp.maximum(z_ref, 0.0)
    ref_a = jnp.maximum(jnp.sum(z_ref, axis=1), 0.0)

    def rel_err(a, b):
        return float(jnp.max(jnp.abs(a - b)) / (jnp.max(jnp.abs(b)) + 1e-6))

    # f32 operand path.
    out_f32 = jax.block_until_ready(
        gnn_layer_forward(features, adj, weight, compute_dtype=jnp.float32))
    assert out_f32.shape == (N, OUT_F)
    assert rel_err(out_f32, ref) < 1e-2, rel_err(out_f32, ref)

    # Default bf16 operand path (f32 accumulation).
    out_bf = jax.block_until_ready(gnn_layer_forward(features, adj, weight))
    assert out_bf.shape == (N, OUT_F)
    assert rel_err(out_bf, ref) < 3e-2, rel_err(out_bf, ref)

    # active=True (attention pooling; beta == 1 -> row sum), f32 operands.
    out_a = jax.block_until_ready(
        gnn_layer_forward(features, adj, weight, active=True, compute_dtype=jnp.float32))
    assert out_a.shape == (N,)
    assert rel_err(out_a, ref_a) < 1e-2, rel_err(out_a, ref_a)

    # active=True, default bf16 adj.
    out_ab = jax.block_until_ready(gnn_layer_forward(features, adj, weight, active=True))
    assert out_ab.shape == (N,)
    assert rel_err(out_ab, ref_a) < 3e-2, rel_err(out_ab, ref_a)

    print("KERNEL_OK")
</pallas_src>

<mosaic_0001>
module attributes {stable_mosaic.version = 11 : i64} {
  func.func @_support_kernel(%arg0: i32, %arg1: i32, %arg2: memref<384x128xf32, #tpu.memory_space<vmem>>, %arg3: memref<128x128xf32, #tpu.memory_space<vmem>>, %arg4: memref<384x128xf32, #tpu.memory_space<vmem>>, %arg5: memref<384x128xf32, #tpu.memory_space<vmem>>) attributes {dimension_semantics = [#tpu.dimension_semantics<parallel>, #tpu.dimension_semantics<arbitrary>], iteration_bounds = array<i64: 1, 1>, scalar_prefetch = 0 : i64, scratch_operands = 1 : i64, tpu.core_type = #tpu.core_type<tc>, window_params = [{transform_indices = @transform_0, window_bounds = array<i64: 384, 128>}, {transform_indices = @transform_1, window_bounds = array<i64: 128, 128>}, {transform_indices = @transform_2, window_bounds = array<i64: 384, 128>}]} {
    %c0_i32 = arith.constant 0 : i32
    %0 = arith.cmpi eq, %arg1, %c0_i32 : i32
    %1 = arith.extui %0 : i1 to i32
    %c0_i32_0 = arith.constant 0 : i32
    %2 = arith.cmpi ne, %1, %c0_i32_0 : i32
    scf.if %2 {
      %cst_10 = arith.constant 0.000000e+00 : f32
      %12 = vector.broadcast %cst_10 : f32 to vector<384x128xf32>
      %c0_11 = arith.constant 0 : index
      %c0_12 = arith.constant 0 : index
      %13 = vector.load %arg5[%c0_11, %c0_12] : memref<384x128xf32, #tpu.memory_space<vmem>>, vector<384x128xf32>
      tpu.vector_store %arg5[%c0_11, %c0_12], %12 {strides = array<i32>} : memref<384x128xf32, #tpu.memory_space<vmem>>, vector<384x128xf32>,
    } else {
    }
    %c0 = arith.constant 0 : index
    %c0_1 = arith.constant 0 : index
    %3 = vector.load %arg5[%c0, %c0_1] : memref<384x128xf32, #tpu.memory_space<vmem>>, vector<384x128xf32>
    %c0_2 = arith.constant 0 : index
    %c0_3 = arith.constant 0 : index
    %4 = vector.load %arg2[%c0_2, %c0_3] : memref<384x128xf32, #tpu.memory_space<vmem>>, vector<384x128xf32>
    %c0_4 = arith.constant 0 : index
    %c0_5 = arith.constant 0 : index
    %5 = vector.load %arg3[%c0_4, %c0_5] : memref<128x128xf32, #tpu.memory_space<vmem>>, vector<128x128xf32>
    %cst = arith.constant dense<0.000000e+00> : vector<384x128xf32>
    %6 = tpu.matmul %4, %5, %cst {dimension_numbers = #tpu.dot_dimension_numbers<[1], [0], [0], [1], [0, 0, 1, 1], [], []>} : vector<384x128xf32>, vector<128x128xf32>, vector<384x128xf32> -> vector<384x128xf32>
    %7 = arith.addf %3, %6 : vector<384x128xf32>
    %c0_6 = arith.constant 0 : index
    %c0_7 = arith.constant 0 : index
    %8 = vector.load %arg5[%c0_6, %c0_7] : memref<384x128xf32, #tpu.memory_space<vmem>>, vector<384x128xf32>
    tpu.vector_store %arg5[%c0_6, %c0_7], %7 {strides = array<i32>} : memref<384x128xf32, #tpu.memory_space<vmem>>, vector<384x128xf32>,
    %c0_i32_8 = arith.constant 0 : i32
    %9 = arith.cmpi eq, %arg1, %c0_i32_8 : i32
    %10 = arith.extui %9 : i1 to i32
    %c0_i32_9 = arith.constant 0 : i32
    %11 = arith.cmpi ne, %10, %c0_i32_9 : i32
    scf.if %11 {
      %c0_10 = arith.constant 0 : index
      %c0_11 = arith.constant 0 : index
      %12 = vector.load %arg5[%c0_10, %c0_11] : memref<384x128xf32, #tpu.memory_space<vmem>>, vector<384x128xf32>
      %c0_12 = arith.constant 0 : index
      %c0_13 = arith.constant 0 : index
      %13 = vector.load %arg4[%c0_12, %c0_13] : memref<384x128xf32, #tpu.memory_space<vmem>>, vector<384x128xf32>
      tpu.vector_store %arg4[%c0_12, %c0_13], %12 {strides = array<i32>} : memref<384x128xf32, #tpu.memory_space<vmem>>, vector<384x128xf32>,
    } else {
    }
    return
  }
  func.func @transform_0(%arg0: i32, %arg1: i32) -> (i32, i32) {
    %c0_i32 = arith.constant 0 : i32
    return %arg0, %arg1 : i32, i32
  }
  func.func @transform_1(%arg0: i32, %arg1: i32) -> (i32, i32) {
    %c0_i32 = arith.constant 0 : i32
    %c0_i32_0 = arith.constant 0 : i32
    return %arg1, %c0_i32 : i32, i32
  }
  func.func @transform_2(%arg0: i32, %arg1: i32) -> (i32, i32) {
    %c0_i32 = arith.constant 0 : i32
    %c0_i32_0 = arith.constant 0 : i32
    return %arg0, %c0_i32 : i32, i32
  }
}

</mosaic_0001>

<bundles_post_ra>
// kernel: tpu_custom_call.1
= control target key start
LH: loop header
LB: loop body
LE: loop exit
PB: predicated region body
PF: predicated region fallthrough
CT: control target
= control target key end

     0   :  { %7 = vsyncpa [#allocation4], 0  ;;  %s753_s0 = inlined_call_operand.hbm [shape: f32[384,128], index: 0, kind: input, shape index: {}]   ;;  %s754_s1 = inlined_call_operand.hbm [shape: f32[128,128], index: 1, kind: input, shape index: {}]   ;;  %s755_s2 = inlined_call_operand.hbm [shape: f32[384,128], index: 2, kind: output, shape index: {}]  }
   0x1   :  { %8 = vsyncpa [#allocation7], 0 }
   0x2   :  { %9 = vsyncpa [#allocation5], 0  ;;  %s14_s11 = sshll.u32 %s753_s0, 4  ;;  %s715_s12 = smov [#allocation3]   ;;  %s15_s11 = int_to_ptr.hbm [resolvable:$true] %s14_s11 }
   0x3   :  { %s16_s13 = sshll.u32 %s715_s12, 4  ;;  %s27_s16 = sshll.u32 %s754_s1, 4  ;;  %s17_s13 = int_to_ptr.vmem [resolvable:$true] %s16_s13  ;;  %s28_s16 = int_to_ptr.hbm [resolvable:$true] %s27_s16 }
   0x4   :  { %s716_s17 = smov 128   ;;  %s717_s18 = smov 8  }
   0x5   :  { %22 = dma.hbm_to_vmem [thread:$0]  %s15_s11, 6144, %s17_s13, [#allocation4], %s716_s17, %s716_s17, %s717_s18  }
   0x6   :  { %s718_s19 = smov [#allocation6]  }
   0x7   :  { %s29_s20 = sshll.u32 %s718_s19, 4  ;;  %s30_s20 = int_to_ptr.vmem [resolvable:$true] %s29_s20 }
   0x8   :  { %35 = dma.hbm_to_vmem [thread:$0]  %s28_s16, 2048, %s30_s20, [#allocation7], %s716_s17, %s716_s17, %s717_s18  }
   0x9   :  { %709 = dma.done.wait [#allocation4], 6144  }
   0xa   :  { %710 = vsyncadd [#allocation4], 4294961152 }
   0xb   :  { %711 = dma.done.wait [#allocation7], 2048  }
   0xc   :  { %712 = vsyncadd [#allocation7], 4294965248  ;;  %v207_v0 = vld [vmem:[#allocation6 + $0x78] sm:$0xff]  ;;  %v206_v1 = vld [vmem:[#allocation6 + $0x70] sm:$0xff]  ;;  %s719_s0 = smov [#allocation8]   ;;  %s570_s23 = sshll.u32 %s755_s2, 4  ;;  %s571_s23 = int_to_ptr.hbm [resolvable:$true] %s570_s23 }
   0xd   :  { %585 = vmatpush.msra.mxu2 %v207_v0  ;;  %586 = vmatpush.msra.mxu3 %v207_v0  ;;  %v205_v2 = vld [vmem:[#allocation6 + $0x68] sm:$0xff]  ;;  %v204_v3 = vld [vmem:[#allocation6 + $0x60] sm:$0xff]  ;;  %v203_v4 = vld [vmem:[#allocation6 + $0x58] sm:$0xff]  ;;  %s568_s1 = sshll.u32 %s719_s0, 4  ;;  %s569_s1 = int_to_ptr.vmem [resolvable:$true] %s568_s1 }
   0xe   :  { %208 = vmatpush.msra.mxu0 %v207_v0  ;;  %584 = vmatpush.msra.mxu1 %v207_v0  ;;  %v202_v5 = vld [vmem:[#allocation6 + $0x50] sm:$0xff]  ;;  %v201_v6 = vld [vmem:[#allocation6 + $0x48] sm:$0xff]  ;;  %v200_v7 = vld [vmem:[#allocation6 + $0x40] sm:$0xff] }
   0xf   :  { %588 = vmatpush.msra.mxu2 %v206_v1  ;;  %589 = vmatpush.msra.mxu3 %v206_v1  ;;  %v199_v8 = vld [vmem:[#allocation6 + $0x38] sm:$0xff]  ;;  %v198_v9 = vld [vmem:[#allocation6 + $0x30] sm:$0xff]  ;;  %v197_v10 = vld [vmem:[#allocation6 + $0x28] sm:$0xff] }
  0x10   :  { %209 = vmatpush.msra.mxu0 %v206_v1  ;;  %587 = vmatpush.msra.mxu1 %v206_v1  ;;  %v196_v11 = vld [vmem:[#allocation6 + $0x20] sm:$0xff]  ;;  %v195_v12 = vld [vmem:[#allocation6 + $0x18] sm:$0xff]  ;;  %v194_v13 = vld [vmem:[#allocation6 + $0x10] sm:$0xff] }
  0x11   :  { %591 = vmatpush.msra.mxu2 %v205_v2  ;;  %592 = vmatpush.msra.mxu3 %v205_v2  ;;  %v193_v14 = vld [vmem:[#allocation6 + $0x8] sm:$0xff]  ;;  %v192_v15 = vld [vmem:[#allocation6] sm:$0xff]  ;;  %v170_v24 = vld [vmem:[#allocation3 + $0xd0] sm:$0xff] }
  0x12   :  { %210 = vmatpush.msra.mxu0 %v205_v2  ;;  %590 = vmatpush.msra.mxu1 %v205_v2  ;;  %v168_v16 = vld [vmem:[#allocation3 + $0xc0] sm:$0xff]  ;;  %v169_v20 = vld [vmem:[#allocation3 + $0xc8] sm:$0xff]  ;;  %v182_v25 = vld [vmem:[#allocation3 + $0x130] sm:$0xff] }
  0x13   :  { %594 = vmatpush.msra.mxu2 %v204_v3  ;;  %595 = vmatpush.msra.mxu3 %v204_v3  ;;  %v180_v17 = vld [vmem:[#allocation3 + $0x120] sm:$0xff]  ;;  %v181_v21 = vld [vmem:[#allocation3 + $0x128] sm:$0xff]  ;;  %v146_v26 = vld [vmem:[#allocation3 + $0x10] sm:$0xff] }
  0x14   :  { %211 = vmatpush.msra.mxu0 %v204_v3  ;;  %593 = vmatpush.msra.mxu1 %v204_v3  ;;  %v144_v18 = vld [vmem:[#allocation3] sm:$0xff]  ;;  %v145_v22 = vld [vmem:[#allocation3 + $0x8] sm:$0xff]  ;;  %v158_v27 = vld [vmem:[#allocation3 + $0x70] sm:$0xff] }
  0x15   :  { %597 = vmatpush.msra.mxu2 %v203_v4  ;;  %598 = vmatpush.msra.mxu3 %v203_v4  ;;  %v156_v19 = vld [vmem:[#allocation3 + $0x60] sm:$0xff]  ;;  %v157_v23 = vld [vmem:[#allocation3 + $0x68] sm:$0xff]  ;;  %v171_v28 = vld [vmem:[#allocation3 + $0xd8] sm:$0xff] }
  0x16   :  { %212 = vmatpush.msra.mxu0 %v203_v4  ;;  %596 = vmatpush.msra.mxu1 %v203_v4  ;;  %v183_v29 = vld [vmem:[#allocation3 + $0x138] sm:$0xff]  ;;  %v172_v32 = vld [vmem:[#allocation3 + $0xe0] sm:$0xff]  ;;  %v173_v36 = vld [vmem:[#allocation3 + $0xe8] sm:$0xff] }
  0x17   :  { %600 = vmatpush.msra.mxu2 %v202_v5  ;;  %601 = vmatpush.msra.mxu3 %v202_v5  ;;  %v147_v30 = vld [vmem:[#allocation3 + $0x18] sm:$0xff]  ;;  %v184_v33 = vld [vmem:[#allocation3 + $0x140] sm:$0xff]  ;;  %v185_v37 = vld [vmem:[#allocation3 + $0x148] sm:$0xff] }
  0x18   :  { %213 = vmatpush.msra.mxu0 %v202_v5  ;;  %599 = vmatpush.msra.mxu1 %v202_v5  ;;  %v159_v31 = vld [vmem:[#allocation3 + $0x78] sm:$0xff]  ;;  %v148_v34 = vld [vmem:[#allocation3 + $0x20] sm:$0xff]  ;;  %v149_v38 = vld [vmem:[#allocation3 + $0x28] sm:$0xff] }
  0x19   :  { %603 = vmatpush.msra.mxu2 %v201_v6  ;;  %604 = vmatpush.msra.mxu3 %v201_v6  ;;  %v160_v35 = vld [vmem:[#allocation3 + $0x80] sm:$0xff]  ;;  %v161_v39 = vld [vmem:[#allocation3 + $0x88] sm:$0xff]  ;;  %v174_v40 = vld [vmem:[#allocation3 + $0xf0] sm:$0xff] }
  0x1a   :  { %214 = vmatpush.msra.mxu0 %v201_v6  ;;  %602 = vmatpush.msra.mxu1 %v201_v6  ;;  %v186_v41 = vld [vmem:[#allocation3 + $0x150] sm:$0xff]  ;;  %v175_v44 = vld [vmem:[#allocation3 + $0xf8] sm:$0xff]  ;;  %v176_v48 = vld [vmem:[#allocation3 + $0x100] sm:$0xff] }
  0x1b   :  { %606 = vmatpush.msra.mxu2 %v200_v7  ;;  %607 = vmatpush.msra.mxu3 %v200_v7  ;;  %v150_v42 = vld [vmem:[#allocation3 + $0x30] sm:$0xff]  ;;  %v187_v45 = vld [vmem:[#allocation3 + $0x158] sm:$0xff]  ;;  %v188_v49 = vld [vmem:[#allocation3 + $0x160] sm:$0xff] }
  0x1c   :  { %215 = vmatpush.msra.mxu0 %v200_v7  ;;  %605 = vmatpush.msra.mxu1 %v200_v7  ;;  %v162_v43 = vld [vmem:[#allocation3 + $0x90] sm:$0xff]  ;;  %v151_v46 = vld [vmem:[#allocation3 + $0x38] sm:$0xff]  ;;  %v152_v50 = vld [vmem:[#allocation3 + $0x40] sm:$0xff] }
  0x1d   :  { %609 = vmatpush.msra.mxu2 %v199_v8  ;;  %610 = vmatpush.msra.mxu3 %v199_v8  ;;  %v163_v47 = vld [vmem:[#allocation3 + $0x98] sm:$0xff]  ;;  %v164_v51 = vld [vmem:[#allocation3 + $0xa0] sm:$0xff]  ;;  %v177_v52 = vld [vmem:[#allocation3 + $0x108] sm:$0xff] }
  0x1e   :  { %216 = vmatpush.msra.mxu0 %v199_v8  ;;  %608 = vmatpush.msra.mxu1 %v199_v8  ;;  %v189_v53 = vld [vmem:[#allocation3 + $0x168] sm:$0xff]  ;;  %v178_v56 = vld [vmem:[#allocation3 + $0x110] sm:$0xff]  ;;  %v179_v60 = vld [vmem:[#allocation3 + $0x118] sm:$0xff] }
  0x1f   :  { %612 = vmatpush.msra.mxu2 %v198_v9  ;;  %613 = vmatpush.msra.mxu3 %v198_v9  ;;  %v153_v54 = vld [vmem:[#allocation3 + $0x48] sm:$0xff]  ;;  %v190_v57 = vld [vmem:[#allocation3 + $0x170] sm:$0xff]  ;;  %v191_v61 = vld [vmem:[#allocation3 + $0x178] sm:$0xff] }
  0x20   :  { %217 = vmatpush.msra.mxu0 %v198_v9  ;;  %611 = vmatpush.msra.mxu1 %v198_v9  ;;  %v165_v55 = vld [vmem:[#allocation3 + $0xa8] sm:$0xff]  ;;  %v154_v58 = vld [vmem:[#allocation3 + $0x50] sm:$0xff]  ;;  %v155_v62 = vld [vmem:[#allocation3 + $0x58] sm:$0xff] }
  0x21   :  { %615 = vmatpush.msra.mxu2 %v197_v10  ;;  %616 = vmatpush.msra.mxu3 %v197_v10  ;;  %v166_v59 = vld [vmem:[#allocation3 + $0xb0] sm:$0xff]  ;;  %v167_v63 = vld [vmem:[#allocation3 + $0xb8] sm:$0xff] }
  0x22   :  { %218 = vmatpush.msra.mxu0 %v197_v10  ;;  %614 = vmatpush.msra.mxu1 %v197_v10 }
  0x23   :  { %618 = vmatpush.msra.mxu2 %v196_v11  ;;  %619 = vmatpush.msra.mxu3 %v196_v11 }
  0x24   :  { %219 = vmatpush.msra.mxu0 %v196_v11  ;;  %617 = vmatpush.msra.mxu1 %v196_v11 }
  0x25   :  { %621 = vmatpush.msra.mxu2 %v195_v12  ;;  %622 = vmatpush.msra.mxu3 %v195_v12 }
  0x26   :  { %220 = vmatpush.msra.mxu0 %v195_v12  ;;  %620 = vmatpush.msra.mxu1 %v195_v12 }
  0x27   :  { %624 = vmatpush.msra.mxu2 %v194_v13  ;;  %625 = vmatpush.msra.mxu3 %v194_v13 }
  0x28   :  { %221 = vmatpush.msra.mxu0 %v194_v13  ;;  %623 = vmatpush.msra.mxu1 %v194_v13 }
  0x29   :  { %627 = vmatpush.msra.mxu2 %v193_v14  ;;  %628 = vmatpush.msra.mxu3 %v193_v14 }
  0x2a   :  { %222 = vmatpush.msra.mxu0 %v193_v14  ;;  %626 = vmatpush.msra.mxu1 %v193_v14 }
  0x2b   :  { %630 = vmatpush.msra.mxu2 %v192_v15  ;;  %631 = vmatpush.msra.mxu3 %v192_v15 }
  0x2c   :  { %296 = vmatmul.f32.vlgmr.msra.gmra.mxu2 %v168_v16  ;;  %332 = vmatmul.f32.vlgmr.msra.gmra.mxu3 %v180_v17 }
  0x2d   :  { %223 = vmatpush.msra.mxu0 %v192_v15  ;;  %629 = vmatpush.msra.mxu1 %v192_v15 }
  0x2e   :  { %224 = vmatmul.f32.vlgmr.msra.gmra.mxu0 %v144_v18  ;;  %260 = vmatmul.f32.vlgmr.msra.gmra.mxu1 %v156_v19 }
  0x34   :  { %299 = vmatmul.f32.gmra.mxu2 %v169_v20  ;;  %335 = vmatmul.f32.gmra.mxu3 %v181_v21 }
  0x36   :  { %227 = vmatmul.f32.gmra.mxu0 %v145_v22  ;;  %263 = vmatmul.f32.gmra.mxu1 %v157_v23 }
  0x3c   :  { %302 = vmatmul.f32.gmra.mxu2 %v170_v24  ;;  %338 = vmatmul.f32.gmra.mxu3 %v182_v25 }
  0x3e   :  { %230 = vmatmul.f32.gmra.mxu0 %v146_v26  ;;  %266 = vmatmul.f32.gmra.mxu1 %v158_v27 }
  0x44   :  { %305 = vmatmul.f32.gmra.mxu2 %v171_v28  ;;  %341 = vmatmul.f32.gmra.mxu3 %v183_v29 }
  0x46   :  { %233 = vmatmul.f32.gmra.mxu0 %v147_v30  ;;  %269 = vmatmul.f32.gmra.mxu1 %v159_v31 }
  0x4c   :  { %308 = vmatmul.f32.gmra.mxu2 %v172_v32  ;;  %344 = vmatmul.f32.gmra.mxu3 %v184_v33 }
  0x4e   :  { %236 = vmatmul.f32.gmra.mxu0 %v148_v34  ;;  %272 = vmatmul.f32.gmra.mxu1 %v160_v35 }
  0x54   :  { %311 = vmatmul.f32.gmra.mxu2 %v173_v36  ;;  %347 = vmatmul.f32.gmra.mxu3 %v185_v37 }
  0x56   :  { %239 = vmatmul.f32.gmra.mxu0 %v149_v38  ;;  %275 = vmatmul.f32.gmra.mxu1 %v161_v39 }
  0x5c   :  { %314 = vmatmul.f32.gmra.mxu2 %v174_v40  ;;  %350 = vmatmul.f32.gmra.mxu3 %v186_v41 }
  0x5e   :  { %242 = vmatmul.f32.gmra.mxu0 %v150_v42  ;;  %278 = vmatmul.f32.gmra.mxu1 %v162_v43 }
  0x64   :  { %317 = vmatmul.f32.gmra.mxu2 %v175_v44  ;;  %353 = vmatmul.f32.gmra.mxu3 %v187_v45 }
  0x66   :  { %245 = vmatmul.f32.gmra.mxu0 %v151_v46  ;;  %281 = vmatmul.f32.gmra.mxu1 %v163_v47 }
  0x6c   :  { %320 = vmatmul.f32.gmra.mxu2 %v176_v48  ;;  %356 = vmatmul.f32.gmra.mxu3 %v188_v49 }
  0x6e   :  { %248 = vmatmul.f32.gmra.mxu0 %v152_v50  ;;  %284 = vmatmul.f32.gmra.mxu1 %v164_v51 }
  0x74   :  { %323 = vmatmul.f32.gmra.mxu2 %v177_v52  ;;  %359 = vmatmul.f32.gmra.mxu3 %v189_v53 }
  0x76   :  { %251 = vmatmul.f32.gmra.mxu0 %v153_v54  ;;  %287 = vmatmul.f32.gmra.mxu1 %v165_v55 }
  0x7c   :  { %326 = vmatmul.f32.gmra.mxu2 %v178_v56  ;;  %362 = vmatmul.f32.gmra.mxu3 %v190_v57 }
  0x7e   :  { %254 = vmatmul.f32.gmra.mxu0 %v154_v58  ;;  %290 = vmatmul.f32.gmra.mxu1 %v166_v59 }
  0x84   :  { %329 = vmatmul.f32.gmra.mxu2 %v179_v60  ;;  %365 = vmatmul.f32.gmra.mxu3 %v191_v61 }
  0x86   :  { %257 = vmatmul.f32.gmra.mxu0 %v155_v62  ;;  %293 = vmatmul.f32.gmra.mxu1 %v167_v63 }
  0xab   :  { %v225_v0 = vpop.f32.mrf.mxu0  ;;  %v261_v1 = vpop.f32.mrf.mxu1 }
  0xac   :  { %516 = vst [vmem:[#allocation8] sm:$0xff] %v225_v0 }
  0xad   :  { %528 = vst [vmem:[#allocation8 + $0x60] sm:$0xff] %v261_v1 }
  0xaf   :  { %v297_v2 = vpop.f32.mrf.mxu2  ;;  %v333_v3 = vpop.f32.mrf.mxu3 }
  0xb0   :  { %540 = vst [vmem:[#allocation8 + $0xc0] sm:$0xff] %v297_v2 }
  0xb1   :  { %552 = vst [vmem:[#allocation8 + $0x120] sm:$0xff] %v333_v3 }
  0xb3   :  { %v228_v4 = vpop.f32.mrf.mxu0  ;;  %v264_v5 = vpop.f32.mrf.mxu1 }
  0xb4   :  { %517 = vst [vmem:[#allocation8 + $0x8] sm:$0xff] %v228_v4 }
  0xb5   :  { %529 = vst [vmem:[#allocation8 + $0x68] sm:$0xff] %v264_v5 }
  0xb7   :  { %v300_v6 = vpop.f32.mrf.mxu2  ;;  %v336_v7 = vpop.f32.mrf.mxu3 }
  0xb8   :  { %541 = vst [vmem:[#allocation8 + $0xc8] sm:$0xff] %v300_v6 }
  0xb9   :  { %553 = vst [vmem:[#allocation8 + $0x128] sm:$0xff] %v336_v7 }
  0xbb   :  { %v231_v8 = vpop.f32.mrf.mxu0  ;;  %v267_v9 = vpop.f32.mrf.mxu1 }
  0xbc   :  { %518 = vst [vmem:[#allocation8 + $0x10] sm:$0xff] %v231_v8 }
  0xbd   :  { %530 = vst [vmem:[#allocation8 + $0x70] sm:$0xff] %v267_v9 }
  0xbf   :  { %v303_v10 = vpop.f32.mrf.mxu2  ;;  %v339_v11 = vpop.f32.mrf.mxu3 }
  0xc0   :  { %542 = vst [vmem:[#allocation8 + $0xd0] sm:$0xff] %v303_v10 }
  0xc1   :  { %554 = vst [vmem:[#allocation8 + $0x130] sm:$0xff] %v339_v11 }
  0xc3   :  { %v234_v12 = vpop.f32.mrf.mxu0  ;;  %v270_v13 = vpop.f32.mrf.mxu1 }
  0xc4   :  { %519 = vst [vmem:[#allocation8 + $0x18] sm:$0xff] %v234_v12 }
  0xc5   :  { %531 = vst [vmem:[#allocation8 + $0x78] sm:$0xff] %v270_v13 }
  0xc7   :  { %v306_v14 = vpop.f32.mrf.mxu2  ;;  %v342_v15 = vpop.f32.mrf.mxu3 }
  0xc8   :  { %543 = vst [vmem:[#allocation8 + $0xd8] sm:$0xff] %v306_v14 }
  0xc9   :  { %555 = vst [vmem:[#allocation8 + $0x138] sm:$0xff] %v342_v15 }
  0xcb   :  { %v237_v16 = vpop.f32.mrf.mxu0  ;;  %v273_v17 = vpop.f32.mrf.mxu1 }
  0xcc   :  { %520 = vst [vmem:[#allocation8 + $0x20] sm:$0xff] %v237_v16 }
  0xcd   :  { %532 = vst [vmem:[#allocation8 + $0x80] sm:$0xff] %v273_v17 }
  0xcf   :  { %v309_v18 = vpop.f32.mrf.mxu2  ;;  %v345_v19 = vpop.f32.mrf.mxu3 }
  0xd0   :  { %544 = vst [vmem:[#allocation8 + $0xe0] sm:$0xff] %v309_v18 }
  0xd1   :  { %556 = vst [vmem:[#allocation8 + $0x140] sm:$0xff] %v345_v19 }
  0xd3   :  { %v240_v20 = vpop.f32.mrf.mxu0  ;;  %v276_v21 = vpop.f32.mrf.mxu1 }
  0xd4   :  { %521 = vst [vmem:[#allocation8 + $0x28] sm:$0xff] %v240_v20 }
  0xd5   :  { %533 = vst [vmem:[#allocation8 + $0x88] sm:$0xff] %v276_v21 }
  0xd7   :  { %v312_v22 = vpop.f32.mrf.mxu2  ;;  %v348_v23 = vpop.f32.mrf.mxu3 }
  0xd8   :  { %545 = vst [vmem:[#allocation8 + $0xe8] sm:$0xff] %v312_v22 }
  0xd9   :  { %557 = vst [vmem:[#allocation8 + $0x148] sm:$0xff] %v348_v23 }
  0xdb   :  { %v243_v24 = vpop.f32.mrf.mxu0  ;;  %v279_v25 = vpop.f32.mrf.mxu1 }
  0xdc   :  { %522 = vst [vmem:[#allocation8 + $0x30] sm:$0xff] %v243_v24 }
  0xdd   :  { %534 = vst [vmem:[#allocation8 + $0x90] sm:$0xff] %v279_v25 }
  0xdf   :  { %v315_v26 = vpop.f32.mrf.mxu2  ;;  %v351_v27 = vpop.f32.mrf.mxu3 }
  0xe0   :  { %546 = vst [vmem:[#allocation8 + $0xf0] sm:$0xff] %v315_v26 }
  0xe1   :  { %558 = vst [vmem:[#allocation8 + $0x150] sm:$0xff] %v351_v27 }
  0xe3   :  { %v246_v28 = vpop.f32.mrf.mxu0  ;;  %v282_v29 = vpop.f32.mrf.mxu1 }
  0xe4   :  { %523 = vst [vmem:[#allocation8 + $0x38] sm:$0xff] %v246_v28 }
  0xe5   :  { %535 = vst [vmem:[#allocation8 + $0x98] sm:$0xff] %v282_v29 }
  0xe7   :  { %v318_v30 = vpop.f32.mrf.mxu2  ;;  %v354_v31 = vpop.f32.mrf.mxu3 }
  0xe8   :  { %547 = vst [vmem:[#allocation8 + $0xf8] sm:$0xff] %v318_v30 }
  0xe9   :  { %559 = vst [vmem:[#allocation8 + $0x158] sm:$0xff] %v354_v31 }
  0xeb   :  { %v249_v32 = vpop.f32.mrf.mxu0  ;;  %v285_v33 = vpop.f32.mrf.mxu1 }
  0xec   :  { %524 = vst [vmem:[#allocation8 + $0x40] sm:$0xff] %v249_v32 }
  0xed   :  { %536 = vst [vmem:[#allocation8 + $0xa0] sm:$0xff] %v285_v33 }
  0xef   :  { %v321_v34 = vpop.f32.mrf.mxu2  ;;  %v357_v35 = vpop.f32.mrf.mxu3 }
  0xf0   :  { %548 = vst [vmem:[#allocation8 + $0x100] sm:$0xff] %v321_v34 }
  0xf1   :  { %560 = vst [vmem:[#allocation8 + $0x160] sm:$0xff] %v357_v35 }
  0xf3   :  { %v252_v36 = vpop.f32.mrf.mxu0  ;;  %v288_v37 = vpop.f32.mrf.mxu1 }
  0xf4   :  { %525 = vst [vmem:[#allocation8 + $0x48] sm:$0xff] %v252_v36 }
  0xf5   :  { %537 = vst [vmem:[#allocation8 + $0xa8] sm:$0xff] %v288_v37 }
  0xf7   :  { %v324_v38 = vpop.f32.mrf.mxu2  ;;  %v360_v39 = vpop.f32.mrf.mxu3 }
  0xf8   :  { %549 = vst [vmem:[#allocation8 + $0x108] sm:$0xff] %v324_v38 }
  0xf9   :  { %561 = vst [vmem:[#allocation8 + $0x168] sm:$0xff] %v360_v39 }
  0xfb   :  { %v255_v40 = vpop.f32.mrf.mxu0  ;;  %v291_v41 = vpop.f32.mrf.mxu1 }
  0xfc   :  { %526 = vst [vmem:[#allocation8 + $0x50] sm:$0xff] %v255_v40 }
  0xfd   :  { %538 = vst [vmem:[#allocation8 + $0xb0] sm:$0xff] %v291_v41 }
  0xff   :  { %v327_v42 = vpop.f32.mrf.mxu2  ;;  %v363_v43 = vpop.f32.mrf.mxu3 }
 0x100   :  { %550 = vst [vmem:[#allocation8 + $0x110] sm:$0xff] %v327_v42 }
 0x101   :  { %562 = vst [vmem:[#allocation8 + $0x170] sm:$0xff] %v363_v43 }
 0x103   :  { %v258_v44 = vpop.f32.mrf.mxu0  ;;  %v294_v45 = vpop.f32.mrf.mxu1 }
 0x104   :  { %527 = vst [vmem:[#allocation8 + $0x58] sm:$0xff] %v258_v44 }
 0x105   :  { %539 = vst [vmem:[#allocation8 + $0xb8] sm:$0xff] %v294_v45 }
 0x107   :  { %v330_v46 = vpop.f32.mrf.mxu2  ;;  %v366_v47 = vpop.f32.mrf.mxu3 }
 0x108   :  { %551 = vst [vmem:[#allocation8 + $0x118] sm:$0xff] %v330_v46 }
 0x109   :  { %563 = vst [vmem:[#allocation8 + $0x178] sm:$0xff] %v366_v47 }
 0x10a   :  { %576 = dma.vmem_to_hbm [thread:$0]  %s569_s1, 6144, %s571_s23, [#allocation5], %s716_s17, %s716_s17, %s717_s18  }
 0x10b   :  { %713 = dma.done.wait [#allocation5], 6144  }
 0x10c   :  { %714 = vsyncadd [#allocation5], 4294961152 }
 0x10d   :  { %581 = vsyncpa [#allocation4], 1 }
 0x10e   :  { %582 = vsyncpa [#allocation7], 1 }
 0x10f   :  { %583 = vsyncpa [#allocation5], 1 }

</bundles_post_ra>
